<compile_context>
chip_gen: v7x
topology: tpu7x:2x2x1
jax: 0.10.0
libtpu: 0.0.40
codegen_flags: <defaults>
</compile_context>

<pallas_src>
import functools

import jax
import jax.numpy as jnp
from jax.experimental import pallas as pl
from jax.experimental.pallas import tpu as pltpu


def _round_up(a, b):
    return (a + b - 1) // b * b


# ----------------------------------------------------------------------------
# One-time cached hardware / capability probes.
# ----------------------------------------------------------------------------
@functools.lru_cache(maxsize=1)
def _vmem_capacity_bytes():
    """Per-core VMEM capacity; conservative 64 MiB (v7x per-TC) if unknown."""
    try:
        return int(pltpu.get_tpu_info().vmem_capacity_bytes)
    except Exception:
        return 64 << 20


@functools.lru_cache(maxsize=1)
def _supports_single_buffered_weights():
    """Tiny cached test compile for pipeline_mode=pl.Buffered(1).

    Replaces the previous blanket try/except retry around the real kernel
    (which could mask genuine errors and re-ran with a LARGER footprint).
    """
    if not hasattr(pl, "Buffered"):
        return False

    def probe(x_ref, w_ref, o_ref):
        o_ref[...] = x_ref[...] + w_ref[...]

    try:
        out = pl.pallas_call(
            probe,
            out_shape=jax.ShapeDtypeStruct((8, 128), jnp.float32),
            grid=(1,),
            in_specs=[
                pl.BlockSpec((8, 128), lambda i: (0, 0)),
                pl.BlockSpec((8, 128), lambda i: (0, 0),
                             pipeline_mode=pl.Buffered(1)),
            ],
            out_specs=pl.BlockSpec((8, 128), lambda i: (0, 0)),
        )(jnp.zeros((8, 128), jnp.float32), jnp.ones((8, 128), jnp.float32))
        jax.block_until_ready(out)
        return True
    except Exception:
        return False


# ----------------------------------------------------------------------------
# VMEM budgeting / row-tile selection (generation-aware).
# ----------------------------------------------------------------------------
def _vmem_estimate(tm, K, n_total, n_in, in_bytes, out_bytes, weight_buf):
    weights = weight_buf * (K * n_total * in_bytes + 8 * n_total * 4)  # W + b
    inputs = 2 * n_in * tm * K * in_bytes          # double-buffered row tiles
    outputs = 2 * tm * n_total * out_bytes         # double-buffered out tiles
    acc = tm * n_total * 4                         # f32 accumulator / spills
    return weights + inputs + outputs + acc


def _pick_row_tile(K, n_total, n_in, in_bytes, out_bytes, weight_buf, vmem_cap):
    budget = (vmem_cap * 3) // 4                   # leave compiler headroom
    for tm in (1024, 512, 256, 128, 64, 32, 16, 8):
        if _vmem_estimate(tm, K, n_total, n_in, in_bytes, out_bytes,
                          weight_buf) <= budget:
            return tm
    return 8


# ----------------------------------------------------------------------------
# Kernels: one row tile of tokens -> five lane-dense projection chunks.
# ----------------------------------------------------------------------------
def _self_kernel(x_ref, w_ref, b_ref, q_ref, kd_ref, vd_ref, ke_ref, ve_ref):
    # Self-attention: x read from HBM once per row tile, one wide MXU matmul
    # against the VMEM-resident concatenated [q|k_d|v_d|k_e|v_e] weights.
    acc = jnp.dot(x_ref[...], w_ref[...], preferred_element_type=jnp.float32)
    acc = acc + b_ref[...]
    n = q_ref.shape[-1]
    for c, o_ref in enumerate((q_ref, kd_ref, vd_ref, ke_ref, ve_ref)):
        o_ref[...] = acc[:, c * n:(c + 1) * n].astype(o_ref.dtype)


def _cross_kernel(x_ref, xkv_ref, w_qkv_ref, b_qkv_ref, w_kv_ref, b_kv_ref,
                  q_ref, kd_ref, vd_ref, ke_ref, ve_ref):
    # Cross-attention: q/k_d/v_d from x, k_e/v_e from attn_kv.
    n = q_ref.shape[-1]
    acc = jnp.dot(x_ref[...], w_qkv_ref[...], preferred_element_type=jnp.float32)
    acc = acc + b_qkv_ref[...]
    for c, o_ref in enumerate((q_ref, kd_ref, vd_ref)):
        o_ref[...] = acc[:, c * n:(c + 1) * n].astype(o_ref.dtype)
    acc = jnp.dot(xkv_ref[...], w_kv_ref[...], preferred_element_type=jnp.float32)
    acc = acc + b_kv_ref[...]
    for c, o_ref in enumerate((ke_ref, ve_ref)):
        o_ref[...] = acc[:, c * n:(c + 1) * n].astype(o_ref.dtype)


# ----------------------------------------------------------------------------
# Wrapper: tiling, specs, budgeting, single pallas_call.
# ----------------------------------------------------------------------------
def fused_qkv_kv_projection(x2d, kv2d, w_qkv, b_qkv, w_kv, b_kv,
                            w_all, b_all, inner):
    """Returns (q, k_d, v_d, k_e, v_e), each of shape (M, inner).

    kv2d may be None (self-attention): x2d is read once per row tile and a
    single wide matmul against the pre-concatenated weight slab produces all
    five output chunks.  Matmul runs in x2d.dtype with f32 accumulation.
    """
    M, K = x2d.shape
    n_total = 5 * inner
    fused = kv2d is None
    compute_dtype = x2d.dtype
    out_dtype = x2d.dtype
    in_bytes = jnp.dtype(compute_dtype).itemsize
    out_bytes = jnp.dtype(out_dtype).itemsize
    n_in = 1 if fused else 2

    single_buf = _supports_single_buffered_weights()
    weight_buf = 1 if single_buf else 2
    vmem_cap = _vmem_capacity_bytes()

    # Largest row tile that fits the live VMEM budget (v5e/v6e 128 MiB ->
    # typically 512/1024 rows; v7x 64 MiB -> smaller for large dims).
    tm = _pick_row_tile(K, n_total, n_in, in_bytes, out_bytes, weight_buf,
                        vmem_cap)
    tm_eff = min(tm, _round_up(M, 8))
    if M > 8:
        # Keep >= 2 grid steps so ("parallel",) can shard row tiles across
        # both TensorCores on v7x; costs at most one extra ~0.35us step.
        tm_eff = min(tm_eff, max(8, _round_up(pl.cdiv(M, 2), 8)))
    grid = (pl.cdiv(M, tm_eff),)   # ragged last block: Pallas masks OOB rows

    def rows(i):
        return (i, 0)

    def const(i):
        return (0, 0)

    # Weights / biases never change across the grid -> VMEM-resident; single
    # buffered when the installed jax supports pl.Buffered(1) (probed once).
    wkw = {"pipeline_mode": pl.Buffered(1)} if single_buf else {}

    if fused:
        kernel = _self_kernel
        in_specs = [
            pl.BlockSpec((tm_eff, K), rows),                  # x row tile
            pl.BlockSpec((K, n_total), const, **wkw),         # W_all resident
            pl.BlockSpec((1, n_total), const, **wkw),         # b_all (f32)
        ]
        operands = (x2d, w_all.astype(compute_dtype), b_all)
    else:
        kernel = _cross_kernel
        in_specs = [
            pl.BlockSpec((tm_eff, K), rows),                  # x row tile
            pl.BlockSpec((tm_eff, K), rows),                  # attn_kv tile
            pl.BlockSpec((K, 3 * inner), const, **wkw),       # W_qkv resident
            pl.BlockSpec((1, 3 * inner), const, **wkw),
            pl.BlockSpec((K, 2 * inner), const, **wkw),       # W_kv resident
            pl.BlockSpec((1, 2 * inner), const, **wkw),
        ]
        operands = (x2d, kv2d, w_qkv.astype(compute_dtype), b_qkv,
                    w_kv.astype(compute_dtype), b_kv)

    out_specs = tuple(pl.BlockSpec((tm_eff, inner), rows) for _ in range(5))
    out_shape = tuple(jax.ShapeDtypeStruct((M, inner), out_dtype)
                      for _ in range(5))

    est = _vmem_estimate(tm_eff, K, n_total, n_in, in_bytes, out_bytes,
                         weight_buf)
    vmem_limit = int(min(vmem_cap, max(est + (4 << 20), 32 << 20)))

    cost = pl.CostEstimate(
        flops=2 * M * K * n_total,
        transcendentals=0,
        bytes_accessed=(n_in * M * K * in_bytes
                        + K * n_total * in_bytes + n_total * 4
                        + M * n_total * out_bytes),
    )

    return pl.pallas_call(
        kernel,
        out_shape=out_shape,
        grid_spec=pltpu.PrefetchScalarGridSpec(
            num_scalar_prefetch=0,
            grid=grid,
            in_specs=in_specs,
            out_specs=out_specs,
        ),
        compiler_params=pltpu.CompilerParams(
            dimension_semantics=("parallel",),
            vmem_limit_bytes=vmem_limit,
        ),
        cost_estimate=cost,
    )(*operands)


# ----------------------------------------------------------------------------
# Module-equivalent wrapper.
# ----------------------------------------------------------------------------
class LinearProjectionConcatKV:
    """JAX/Pallas port of LinearProjection_Concat_kv.

    NOTE: as in the original forward pass, the reshape only works when
    C (== dim) equals inner_dim = heads * dim_head.  Dropout is unused in the
    reference forward, so it is omitted here.
    """

    def __init__(self, dim, heads=8, dim_head=64, key=jax.random.PRNGKey(0)):
        inner_dim = dim_head * heads
        self.dim = dim
        self.heads = heads
        self.inner_dim = inner_dim

        k1, k2, k3, k4 = jax.random.split(key, 4)
        scale = 1.0 / jnp.sqrt(dim)
        # Stored transposed w.r.t. torch.nn.Linear: shape (in, out).
        self.w_qkv = jax.random.uniform(k1, (dim, inner_dim * 3),
                                        jnp.float32, -scale, scale)
        self.b_qkv = jax.random.uniform(k2, (inner_dim * 3,),
                                        jnp.float32, -scale, scale)
        self.w_kv = jax.random.uniform(k3, (dim, inner_dim * 2),
                                       jnp.float32, -scale, scale)
        self.b_kv = jax.random.uniform(k4, (inner_dim * 2,),
                                       jnp.float32, -scale, scale)

        # Precomputed combined [q | k_d | v_d | k_e | v_e] weight/bias for the
        # self-attention fast path (one wide MXU matmul per row tile).
        self.w_all = jnp.concatenate((self.w_qkv, self.w_kv), axis=1)
        self.b_all = jnp.concatenate((self.b_qkv, self.b_kv)).reshape(1, -1)
        self.b_qkv2 = self.b_qkv.reshape(1, -1)
        self.b_kv2 = self.b_kv.reshape(1, -1)

    def __call__(self, x, attn_kv=None):
        B_, N, C = x.shape
        h = self.heads
        hd = C // h

        x2d = x.reshape(B_ * N, C)
        if attn_kv is None:
            kv2d = None
        else:
            assert attn_kv.shape == x.shape, \
                "attn_kv must have the same shape as x"
            kv2d = attn_kv.reshape(B_ * N, C).astype(x.dtype)

        # --- hot path: both projections in a single Pallas kernel -----------
        q, k_d, v_d, k_e, v_e = fused_qkv_kv_projection(
            x2d, kv2d, self.w_qkv, self.b_qkv2, self.w_kv, self.b_kv2,
            self.w_all, self.b_all, self.inner_dim)

        # --- glue kept in XLA: per-head transpose + concat ------------------
        def to_heads(t):
            return t.reshape(B_, N, h, hd).transpose(0, 2, 1, 3)

        q = to_heads(q)
        k = jnp.concatenate((to_heads(k_d), to_heads(k_e)), axis=2)
        v = jnp.concatenate((to_heads(v_d), to_heads(v_e)), axis=2)
        return q, k, v


# ----------------------------------------------------------------------------
# Pure-JAX reference + smoke test.
# ----------------------------------------------------------------------------
def _reference(mod, x, attn_kv=None):
    B_, N, C = x.shape
    h = mod.heads
    hd = C // h
    src = x if attn_kv is None else attn_kv
    xf = x.reshape(B_ * N, C).astype(jnp.float32)
    kf = src.reshape(B_ * N, C).astype(jnp.float32)
    qkv = xf @ mod.w_qkv + mod.b_qkv
    kv = kf @ mod.w_kv + mod.b_kv
    qkv_dec = qkv.reshape(B_, N, 3, h, hd).transpose(2, 0, 3, 1, 4)
    kv_enc = kv.reshape(B_, N, 2, h, hd).transpose(2, 0, 3, 1, 4)
    q, k_d, v_d = qkv_dec[0], qkv_dec[1], qkv_dec[2]
    k_e, v_e = kv_enc[0], kv_enc[1]
    return (q,
            jnp.concatenate((k_d, k_e), axis=2),
            jnp.concatenate((v_d, v_e), axis=2))


def _check(got, want, atol, rtol, name):
    assert got.shape == want.shape, (name, got.shape, want.shape)
    assert jnp.allclose(got.astype(jnp.float32), want, atol=atol, rtol=rtol), name


if __name__ == "__main__":
    key = jax.random.PRNGKey(0)
    kx, kkv, kp, kx2 = jax.random.split(key, 4)

    # dim must equal heads * dim_head for the module's reshape; 128 keeps all
    # output chunks lane-aligned while staying tiny.
    heads, dim_head = 4, 32
    dim = heads * dim_head          # 128
    B, N = 2, 8

    x = jax.random.normal(kx, (B, N, dim), jnp.float32)
    attn_kv = jax.random.normal(kkv, (B, N, dim), jnp.float32)
    mod = LinearProjectionConcatKV(dim, heads=heads, dim_head=dim_head, key=kp)

    # 1) Self-attention (single wide matmul path).
    q, k, v = mod(x)
    jax.block_until_ready((q, k, v))
    qr, kr, vr = _reference(mod, x)
    assert q.shape == (B, heads, N, dim_head)
    assert k.shape == (B, heads, 2 * N, dim_head)
    assert v.shape == (B, heads, 2 * N, dim_head)
    _check(q, qr, 1e-2, 1e-2, "q self")
    _check(k, kr, 1e-2, 1e-2, "k self")
    _check(v, vr, 1e-2, 1e-2, "v self")

    # 2) Cross-attention (two-input kernel).
    q2, k2, v2 = mod(x, attn_kv)
    jax.block_until_ready((q2, k2, v2))
    qr2, kr2, vr2 = _reference(mod, x, attn_kv)
    _check(q2, qr2, 1e-2, 1e-2, "q cross")
    _check(k2, kr2, 1e-2, 1e-2, "k cross")
    _check(v2, vr2, 1e-2, 1e-2, "v cross")

    # 3) Multi-tile grid with a ragged, masked last row block (B*N = 280).
    B3, N3 = 4, 70
    x3 = jax.random.normal(kx2, (B3, N3, dim), jnp.float32)
    q3, k3, v3 = mod(x3)
    jax.block_until_ready((q3, k3, v3))
    qr3, kr3, vr3 = _reference(mod, x3)
    _check(q3, qr3, 1e-2, 1e-2, "q ragged")
    _check(k3, kr3, 1e-2, 1e-2, "k ragged")
    _check(v3, vr3, 1e-2, 1e-2, "v ragged")

    # 4) bf16 fast path: bf16 activations/weights on the MXU, f32 accumulation.
    xb = x.astype(jnp.bfloat16)
    qb, kb, vb = mod(xb)
    jax.block_until_ready((qb, kb, vb))
    qrb, krb, vrb = _reference(mod, xb)
    _check(qb, qrb, 1e-1, 1e-1, "q bf16")
    _check(kb, krb, 1e-1, 1e-1, "k bf16")
    _check(vb, vrb, 1e-1, 1e-1, "v bf16")

    print("KERNEL_OK")
</pallas_src>

<mosaic_0001>
module attributes {stable_mosaic.version = 11 : i64} {
  func.func @probe(%arg0: i32, %arg1: memref<8x128xf32, #tpu.memory_space<vmem>>, %arg2: memref<8x128xf32, #tpu.memory_space<vmem>>, %arg3: memref<8x128xf32, #tpu.memory_space<vmem>>) attributes {dimension_semantics = [#tpu.dimension_semantics<arbitrary>], iteration_bounds = array<i64: 1>, scalar_prefetch = 0 : i64, scratch_operands = 0 : i64, tpu.core_type = #tpu.core_type<tc>, window_params = [{pipeline_mode = #tpu.pipeline_mode<synchronous>, transform_indices = @transform_0, window_bounds = array<i64: 8, 128>}, {pipeline_mode = #tpu.pipeline_mode<synchronous>, transform_indices = @transform_1, window_bounds = array<i64: 8, 128>}, {pipeline_mode = #tpu.pipeline_mode<synchronous>, transform_indices = @transform_2, window_bounds = array<i64: 8, 128>}]} {
    %c0 = arith.constant 0 : index
    %c0_0 = arith.constant 0 : index
    %0 = vector.load %arg1[%c0, %c0_0] : memref<8x128xf32, #tpu.memory_space<vmem>>, vector<8x128xf32>
    %c0_1 = arith.constant 0 : index
    %c0_2 = arith.constant 0 : index
    %1 = vector.load %arg2[%c0_1, %c0_2] : memref<8x128xf32, #tpu.memory_space<vmem>>, vector<8x128xf32>
    %2 = arith.addf %0, %1 : vector<8x128xf32>
    %c0_3 = arith.constant 0 : index
    %c0_4 = arith.constant 0 : index
    %3 = vector.load %arg3[%c0_3, %c0_4] : memref<8x128xf32, #tpu.memory_space<vmem>>, vector<8x128xf32>
    tpu.vector_store %arg3[%c0_3, %c0_4], %2 {strides = array<i32>} : memref<8x128xf32, #tpu.memory_space<vmem>>, vector<8x128xf32>,
    return
  }
  func.func @transform_0(%arg0: i32) -> (i32, i32) {
    %c0_i32 = arith.constant 0 : i32
    %c0_i32_0 = arith.constant 0 : i32
    %c0_i32_1 = arith.constant 0 : i32
    return %c0_i32, %c0_i32_0 : i32, i32
  }
  func.func @transform_1(%arg0: i32) -> (i32, i32) {
    %c0_i32 = arith.constant 0 : i32
    %c0_i32_0 = arith.constant 0 : i32
    %c0_i32_1 = arith.constant 0 : i32
    return %c0_i32, %c0_i32_0 : i32, i32
  }
  func.func @transform_2(%arg0: i32) -> (i32, i32) {
    %c0_i32 = arith.constant 0 : i32
    %c0_i32_0 = arith.constant 0 : i32
    %c0_i32_1 = arith.constant 0 : i32
    return %c0_i32, %c0_i32_0 : i32, i32
  }
}

module attributes {stable_mosaic.version = 11 : i64} {
  func.func @_self_kernel(%arg0: i32, %arg1: memref<8x128xf32, #tpu.memory_space<vmem>>, %arg2: memref<128x640xf32, #tpu.memory_space<vmem>>, %arg3: memref<1x640xf32, #tpu.memory_space<vmem>>, %arg4: memref<8x128xf32, #tpu.memory_space<vmem>>, %arg5: memref<8x128xf32, #tpu.memory_space<vmem>>, %arg6: memref<8x128xf32, #tpu.memory_space<vmem>>, %arg7: memref<8x128xf32, #tpu.memory_space<vmem>>, %arg8: memref<8x128xf32, #tpu.memory_space<vmem>>) attributes {dimension_semantics = [#tpu.dimension_semantics<parallel>], iteration_bounds = array<i64: 2>, scalar_prefetch = 0 : i64, scratch_operands = 0 : i64, tpu.core_type = #tpu.core_type<tc>, window_params = [{transform_indices = @transform_0, window_bounds = array<i64: 8, 128>}, {pipeline_mode = #tpu.pipeline_mode<synchronous>, transform_indices = @transform_1, window_bounds = array<i64: 128, 640>}, {pipeline_mode = #tpu.pipeline_mode<synchronous>, transform_indices = @transform_2, window_bounds = array<i64: 1, 640>}, {transform_indices = @transform_3, window_bounds = array<i64: 8, 128>}, {transform_indices = @transform_4, window_bounds = array<i64: 8, 128>}, {transform_indices = @transform_5, window_bounds = array<i64: 8, 128>}, {transform_indices = @transform_6, window_bounds = array<i64: 8, 128>}, {transform_indices = @transform_7, window_bounds = array<i64: 8, 128>}]} {
    %c0 = arith.constant 0 : index
    %c0_0 = arith.constant 0 : index
    %0 = vector.load %arg1[%c0, %c0_0] : memref<8x128xf32, #tpu.memory_space<vmem>>, vector<8x128xf32>
    %c0_1 = arith.constant 0 : index
    %c0_2 = arith.constant 0 : index
    %1 = vector.load %arg2[%c0_1, %c0_2] : memref<128x640xf32, #tpu.memory_space<vmem>>, vector<128x640xf32>
    %cst = arith.constant dense<0.000000e+00> : vector<8x640xf32>
    %2 = tpu.matmul %0, %1, %cst {dimension_numbers = #tpu.dot_dimension_numbers<[1], [0], [0], [1], [0, 0, 1, 1], [], []>} : vector<8x128xf32>, vector<128x640xf32>, vector<8x640xf32> -> vector<8x640xf32>
    %c0_3 = arith.constant 0 : index
    %c0_4 = arith.constant 0 : index
    %3 = vector.load %arg3[%c0_3, %c0_4] : memref<1x640xf32, #tpu.memory_space<vmem>>, vector<1x640xf32>
    %4 = vector.broadcast %3 : vector<1x640xf32> to vector<8x640xf32>
    %5 = arith.addf %2, %4 : vector<8x640xf32>
    %6 = vector.extract_strided_slice %5 {offsets = [0, 0], sizes = [8, 128], strides = [1, 1]} : vector<8x640xf32> to vector<8x128xf32>
    %c0_5 = arith.constant 0 : index
    %c0_6 = arith.constant 0 : index
    %7 = vector.load %arg4[%c0_5, %c0_6] : memref<8x128xf32, #tpu.memory_space<vmem>>, vector<8x128xf32>
    tpu.vector_store %arg4[%c0_5, %c0_6], %6 {strides = array<i32>} : memref<8x128xf32, #tpu.memory_space<vmem>>, vector<8x128xf32>,
    %8 = vector.extract_strided_slice %5 {offsets = [0, 128], sizes = [8, 128], strides = [1, 1]} : vector<8x640xf32> to vector<8x128xf32>
    %c0_7 = arith.constant 0 : index
    %c0_8 = arith.constant 0 : index
    %9 = vector.load %arg5[%c0_7, %c0_8] : memref<8x128xf32, #tpu.memory_space<vmem>>, vector<8x128xf32>
    tpu.vector_store %arg5[%c0_7, %c0_8], %8 {strides = array<i32>} : memref<8x128xf32, #tpu.memory_space<vmem>>, vector<8x128xf32>,
    %10 = vector.extract_strided_slice %5 {offsets = [0, 256], sizes = [8, 128], strides = [1, 1]} : vector<8x640xf32> to vector<8x128xf32>
    %c0_9 = arith.constant 0 : index
    %c0_10 = arith.constant 0 : index
    %11 = vector.load %arg6[%c0_9, %c0_10] : memref<8x128xf32, #tpu.memory_space<vmem>>, vector<8x128xf32>
    tpu.vector_store %arg6[%c0_9, %c0_10], %10 {strides = array<i32>} : memref<8x128xf32, #tpu.memory_space<vmem>>, vector<8x128xf32>,
    %12 = vector.extract_strided_slice %5 {offsets = [0, 384], sizes = [8, 128], strides = [1, 1]} : vector<8x640xf32> to vector<8x128xf32>
    %c0_11 = arith.constant 0 : index
    %c0_12 = arith.constant 0 : index
    %13 = vector.load %arg7[%c0_11, %c0_12] : memref<8x128xf32, #tpu.memory_space<vmem>>, vector<8x128xf32>
    tpu.vector_store %arg7[%c0_11, %c0_12], %12 {strides = array<i32>} : memref<8x128xf32, #tpu.memory_space<vmem>>, vector<8x128xf32>,
    %14 = vector.extract_strided_slice %5 {offsets = [0, 512], sizes = [8, 128], strides = [1, 1]} : vector<8x640xf32> to vector<8x128xf32>
    %c0_13 = arith.constant 0 : index
    %c0_14 = arith.constant 0 : index
    %15 = vector.load %arg8[%c0_13, %c0_14] : memref<8x128xf32, #tpu.memory_space<vmem>>, vector<8x128xf32>
    tpu.vector_store %arg8[%c0_13, %c0_14], %14 {strides = array<i32>} : memref<8x128xf32, #tpu.memory_space<vmem>>, vector<8x128xf32>,
    return
  }
  func.func @transform_0(%arg0: i32) -> (i32, i32) {
    %c0_i32 = arith.constant 0 : i32
    %c0_i32_0 = arith.constant 0 : i32
    return %arg0, %c0_i32 : i32, i32
  }
  func.func @transform_1(%arg0: i32) -> (i32, i32) {
    %c0_i32 = arith.constant 0 : i32
    %c0_i32_0 = arith.constant 0 : i32
    %c0_i32_1 = arith.constant 0 : i32
    return %c0_i32, %c0_i32_0 : i32, i32
  }
  func.func @transform_2(%arg0: i32) -> (i32, i32) {
    %c0_i32 = arith.constant 0 : i32
    %c0_i32_0 = arith.constant 0 : i32
    %c0_i32_1 = arith.constant 0 : i32
    return %c0_i32, %c0_i32_0 : i32, i32
  }
  func.func @transform_3(%arg0: i32) -> (i32, i32) {
    %c0_i32 = arith.constant 0 : i32
    %c0_i32_0 = arith.constant 0 : i32
    return %arg0, %c0_i32 : i32, i32
  }
  func.func @transform_4(%arg0: i32) -> (i32, i32) {
    %c0_i32 = arith.constant 0 : i32
    %c0_i32_0 = arith.constant 0 : i32
    return %arg0, %c0_i32 : i32, i32
  }
  func.func @transform_5(%arg0: i32) -> (i32, i32) {
    %c0_i32 = arith.constant 0 : i32
    %c0_i32_0 = arith.constant 0 : i32
    return %arg0, %c0_i32 : i32, i32
  }
  func.func @transform_6(%arg0: i32) -> (i32, i32) {
    %c0_i32 = arith.constant 0 : i32
    %c0_i32_0 = arith.constant 0 : i32
    return %arg0, %c0_i32 : i32, i32
  }
  func.func @transform_7(%arg0: i32) -> (i32, i32) {
    %c0_i32 = arith.constant 0 : i32
    %c0_i32_0 = arith.constant 0 : i32
    return %arg0, %c0_i32 : i32, i32
  }
}

</mosaic_0001>

<bundles_post_ra>
// kernel: tpu_custom_call.1
= control target key start
LH: loop header
LB: loop body
LE: loop exit
PB: predicated region body
PF: predicated region fallthrough
CT: control target
= control target key end

     0   :  { %7 = vsyncpa [#allocation3], 0  ;;  %s185_s0 = inlined_call_operand.hbm [shape: f32[8,128], index: 0, kind: input, shape index: {}]   ;;  %s186_s1 = inlined_call_operand.hbm [shape: f32[8,128], index: 1, kind: input, shape index: {}]   ;;  %s187_s2 = inlined_call_operand.hbm [shape: f32[8,128], index: 2, kind: output, shape index: {}]  }
   0x1   :  { %8 = vsyncpa [#allocation6], 0 }
   0x2   :  { %9 = vsyncpa [#allocation4], 0  ;;  %s131_s9 = smov [#allocation2]   ;;  %s132_s11 = smov [#allocation5]  }
   0x3   :  { %s16_s10 = sshll.u32 %s131_s9, 4  ;;  %s26_s12 = sshll.u32 %s132_s11, 4  ;;  %s17_s10 = int_to_ptr.vmem [resolvable:$true] %s16_s10  ;;  %s27_s12 = int_to_ptr.vmem [resolvable:$true] %s26_s12 }
   0x4   :  { %s59_s15 = scalar_lea.hbm %s185_s0, 128 }
   0x5   :  { %p60_p0 = scmp.ne.s32.totalorder %s185_s0, %s59_s15  ;;  %p63_p1 = scmp.lt.u32.totalorder %s59_s15, %s185_s0 }
   0x7   :  { %p65_p2 = pnand %p63_p1, %p60_p0 }
   0x9   :  { %68 = shalt.err (!%p65_p2)
}
   0xa   :  { %s69_s20 = scalar_lea.vmem %s17_s10, 128  ;;  %p74_p4 = scmp.lt.s32.totalorder %s17_s10, %s17_s10 }
   0xb   :  { %p70_p3 = scmp.ne.s32.totalorder %s17_s10, %s69_s20  ;;  %p75_p5 = scmp.lt.s32.totalorder %s69_s20, %s69_s20 }
   0xd   :  { %p76_p6 = por %p75_p5, %p74_p4 }
   0xf   :  { %p77_p7 = pnand %p76_p6, %p70_p3 }
  0x11   :  { %80 = shalt.err (!%p77_p7)
}
  0x12   :  { %19 = dma.hbm_to_vmem [thread:$0]  %s185_s0, 128, %s17_s10, [#allocation3]  }
  0x13   :  { %s81_s25 = scalar_lea.hbm %s186_s1, 128 }
  0x14   :  { %p82_p8 = scmp.ne.s32.totalorder %s186_s1, %s81_s25  ;;  %p85_p9 = scmp.lt.u32.totalorder %s81_s25, %s186_s1 }
  0x16   :  { %p87_p10 = pnand %p85_p9, %p82_p8 }
  0x18   :  { %90 = shalt.err (!%p87_p10)
}
  0x19   :  { %s91_s30 = scalar_lea.vmem %s27_s12, 128  ;;  %p96_p12 = scmp.lt.s32.totalorder %s27_s12, %s27_s12 }
  0x1a   :  { %p92_p11 = scmp.ne.s32.totalorder %s27_s12, %s91_s30  ;;  %p97_p13 = scmp.lt.s32.totalorder %s91_s30, %s91_s30 }
  0x1c   :  { %p98_p0 = por %p97_p13, %p96_p12 }
  0x1e   :  { %p99_p1 = pnand %p98_p0, %p92_p11 }
  0x20   :  { %102 = shalt.err (!%p99_p1)
}
  0x21   :  { %29 = dma.hbm_to_vmem [thread:$0]  %s186_s1, 128, %s27_s12, [#allocation6]  }
  0x22   :  { %125 = dma.done.wait [#allocation3], 128  }
  0x23   :  { %126 = vsyncadd [#allocation3], 4294967168 }
  0x24   :  { %127 = dma.done.wait [#allocation6], 128  }
  0x25   :  { %128 = vsyncadd [#allocation6], 4294967168  ;;  %s133_s4 = smov [#allocation7]   ;;  %v36_v0 = vld [vmem:[#allocation2] sm:$0xff]  ;;  %v37_v1 = vld [vmem:[#allocation5] sm:$0xff] }
  0x26   :  { %s46_s5 = sshll.u32 %s133_s4, 4  ;;  %v38_v2 = vadd.f32 %v37_v1, %v36_v0  ;;  %s47_s5 = int_to_ptr.vmem [resolvable:$true] %s46_s5 }
  0x27   :  { %s103_s6 = scalar_lea.vmem %s47_s5, 128  ;;  %p108_p3 = scmp.lt.s32.totalorder %s47_s5, %s47_s5 }
  0x28   :  { %39 = vst [vmem:[#allocation7] sm:$0xff] %v38_v2  ;;  %p104_p2 = scmp.ne.s32.totalorder %s47_s5, %s103_s6  ;;  %p109_p4 = scmp.lt.s32.totalorder %s103_s6, %s103_s6 }
  0x2a   :  { %p110_p5 = por %p109_p4, %p108_p3 }
  0x2c   :  { %p111_p6 = pnand %p110_p5, %p104_p2 }
  0x2e   :  { %114 = shalt.err (!%p111_p6)
}
  0x2f   :  { %s115_s8 = scalar_lea.hbm %s187_s2, 128 }
  0x30   :  { %p116_p7 = scmp.ne.s32.totalorder %s187_s2, %s115_s8  ;;  %p119_p8 = scmp.lt.u32.totalorder %s115_s8, %s187_s2 }
  0x32   :  { %p121_p9 = pnand %p119_p8, %p116_p7 }
  0x34   :  { %124 = shalt.err (!%p121_p9)
}
  0x35   :  { %49 = dma.vmem_to_hbm [thread:$0]  %s47_s5, 128, %s187_s2, [#allocation4]  }
  0x36   :  { %129 = dma.done.wait [#allocation4], 128  }
  0x37   :  { %130 = vsyncadd [#allocation4], 4294967168 }
  0x38   :  { %53 = vsyncpa [#allocation3], 1 }
  0x39   :  { %54 = vsyncpa [#allocation6], 1 }
  0x3a   :  { %55 = vsyncpa [#allocation4], 1 }

// kernel: tpu_custom_call.1
= control target key start
LH: loop header
LB: loop body
LE: loop exit
PB: predicated region body
PF: predicated region fallthrough
CT: control target
= control target key end

     0   :  { %s1863_s0 = inlined_call_operand.hbm [shape: f32[16,128], index: 0, kind: input, shape index: {}]   ;;  %s1864_s1 = inlined_call_operand.hbm [shape: f32[128,640], index: 1, kind: input, shape index: {}]   ;;  %s1865_s2 = inlined_call_operand.vmem [shape: f32[1,640], index: 2, kind: input, shape index: {}]   ;;  %s1866_s3 = inlined_call_operand.hbm [shape: f32[16,128], index: 3, kind: output, shape index: {0}]   ;;  %s1867_s4 = inlined_call_operand.hbm [shape: f32[16,128], index: 4, kind: output, shape index: {1}]   ;;  %s1868_s5 = inlined_call_operand.hbm [shape: f32[16,128], index: 5, kind: output, shape index: {2}]   ;;  %s1869_s6 = inlined_call_operand.hbm [shape: f32[16,128], index: 6, kind: output, shape index: {3}]   ;;  %s1870_s7 = inlined_call_operand.hbm [shape: f32[16,128], index: 7, kind: output, shape index: {4}]  }
   0x1   :  { %1875 = sst [smem:[#allocation19_spill]] %s1863_s0 }
   0x2   :  { %1876 = sst [smem:[#allocation20_spill]] %s1864_s1 }
   0x3   :  { %13 = vsyncpa [#allocation3], 0 }
   0x4   :  { %15 = vsyncpa [#allocation3 + $0x1], 0 }
   0x5   :  { %16 = vsyncpa [#allocation6], 0 }
   0x6   :  { %17 = vsyncpa [#allocation4], 0 }
   0x7   :  { %19 = vsyncpa [#allocation4 + $0x1], 0 }
   0x8   :  { %20 = vsyncpa [#allocation9], 0 }
   0x9   :  { %22 = vsyncpa [#allocation9 + $0x1], 0 }
   0xa   :  { %23 = vsyncpa [#allocation12], 0 }
   0xb   :  { %25 = vsyncpa [#allocation12 + $0x1], 0  ;;  %s1507_s24 = smov 0   ;;  %s1509_s25 = smov 0  }
   0xc   :  { %s1511_s26 = smov 0   ;;  %s1513_s27 = smov 0  }
   0xd LB: > { %s1528_s28 = sadd.s32 4294967295, %s1453_s27   ;;  %s1874_s29 = sadd.s32 4294967294, %s1453_s27   ;;  %s1453_s27 = sphi %s1513_s27, %s1898_s27   ;;  %s1449_s26 = sphi %s1511_s26, %s1897_s26   ;;  %s1445_s25 = sphi %s1509_s25, %s1896_s25   ;;  %s1441_s24 = sphi %s1507_s24, %s1895_s24  }
   0xe   : > { %p51_p0 = scmp.ne.s32.totalorder %s1445_s25, %s1441_s24  ;;  %p1871_p1 = scmp.eq.s32.totalorder %s1528_s28, 0 }
   0xf   : > { %p123_p3 = scmp.eq.s32.totalorder %s1874_s29, 1  ;;  %p958_p5 = scmp.ge.s32.totalorder %s1453_s27, 1 }
  0x10   : > { %p1539_p4 = por %p1871_p1, %p51_p0  ;;  %p234_p7 = scmp.lt.s32.totalorder %s1453_s27, 3 }
  0x11   : > { %p1544_p6 = por %p123_p3, %p51_p0  ;;  %s1455_s10 = smov [#allocation5]  }
  0x12   : > { %s1877_s30 = scalar_select %p1539_p4, 1, 0 }
  0x13   : > { %s1878_s8 = scalar_select %p1544_p6, 1, 0 }
  0x14   : > { %p1549_p8 = pnand %p958_p5, %p234_p7  ;;  %s246_s11 = sshll.u32 %s1455_s10, 4  ;;  %s1553_s11 = int_to_ptr.vmem [resolvable:$true] %s246_s11 }
  0x15   : > { %s1565_s13 = sadd.s32 1, %s1453_s27   ;;  %s38_s14 = sadd.s32 1, %s1449_s26 }
  0x16   : > { %s1879_s9 = scalar_select %p1549_p8, 1, 0 }
  0x17   : > { %p1139_p9 = pneg %p1549_p8  ;;  %s35_s15 = ssub.s32 %s1453_s27, %s1565_s13 }
  0x18   : > { %s1881_s1 = sld [smem:[#allocation20_spill]] }
  0x19   : > { %p1560_p11 = pnand %p1139_p9, %p1871_p1 }
  0x1b   : > { %p1207_p13 = pneg %p1560_p11 }
  0x1e   : > { %s1205_s18 = scalar_lea.hbm %s1881_s1, 10240 }
  0x1f   : > { %p1206_p12 = scmp.ne.s32.totalorder %s1881_s1, %s1205_s18  ;;  %p1212_p5 = scmp.lt.u32.totalorder %s1205_s18, %s1881_s1 }
  0x21   : > { %p1208_p0 = pnand %p1207_p13, %p1206_p12 }
  0x23   : > { %p1209_p3 = pneg %p1208_p0 }
  0x25   : > { %p1214_p7 = pnand %p1212_p5, %p1209_p3 }
  0x27   : > { %1217 = shalt.err (!%p1214_p7)
}
  0x28   : > { %s1218_s23 = scalar_lea.vmem %s1553_s11, 10240  ;;  %p1226_p2 = scmp.lt.s32.totalorder %s1553_s11, %s1553_s11 }
  0x29   : > { %p1219_p9 = scmp.ne.s32.totalorder %s1553_s11, %s1218_s23  ;;  %p1227_p6 = scmp.lt.s32.totalorder %s1218_s23, %s1218_s23 }
  0x2b   : > { %p1221_p10 = pnand %p1219_p9, %p1207_p13  ;;  %p1228_p4 = por %p1227_p6, %p1226_p2 }
  0x2d   : > { %p1222_p1 = pneg %p1221_p10 }
  0x2f   : > { %p1229_p8 = pnand %p1228_p4, %p1222_p1 }
  0x31   : > { %1232 = shalt.err (!%p1229_p8)
}
  0x32   : > { %s1456_s10 = smov 640   ;;  %s1457_s16 = smov 40  }
  0x33   : > { %1142 = dma.hbm_to_vmem [thread:$0]  (!%p1560_p11), %s1881_s1, 10240, %s1553_s11, [#allocation6], %s1456_s10, %s1456_s10, %s1457_s16  }
  0x34   : > { %p36_p2 = scmp.eq.s32.totalorder %s35_s15, 0  ;;  %p45_p1 = scmp.ne.s32.totalorder %s1449_s26, %s1445_s25 }
  0x35   : > { %p46_p4 = scmp.eq.s32.totalorder %s1453_s27, 0  ;;  %p1164_p6 = scmp.lt.s32.totalorder %s1453_s27, 2 }
  0x36   : > { %s1596_s19 = scalar_select %p36_p2, %s1449_s26, %s38_s14  }
  0x37   : > { %p47_p8 = por %p46_p4, %p45_p1  ;;  %p1882_p10 = scmp.eq.s32.totalorder %s1528_s28, 1 }
  0x38   : > { %s263_s21 = sand.u32 1, %s1449_s26   ;;  %s962_s22 = sshll.u32 %s1453_s27, 7 }
  0x39   : > { %p1600_p12 = por %p1882_p10, %p45_p1  ;;  %s961_s23 = sshll.u32 %s263_s21, 3 }
  0x3a   : > { %s1884_s0 = sld [smem:[#allocation19_spill]]  ;;  %s267_s11 = scalar_lea.vmem [#allocation2], %s961_s23 }
  0x3b   : > { %s274_s14 = sshll.u32 %s267_s11, 4  ;;  %p1611_p11 = pnand %p1164_p6, %p47_p8  ;;  %s1615_s14 = int_to_ptr.vmem [resolvable:$true] %s274_s14 }
  0x3c   : > { %s264_s10 = scalar_lea.sflag [#allocation3], %s263_s21 }
  0x3d   : > { %p1235_p0 = pneg %p1611_p11 }
  0x40   : > { %s1609_s17 = scalar_lea.hbm %s1884_s0, %s962_s22  ;;  %s1238_s22 = scalar_lea.hbm %s1884_s0, 256 }
  0x41   : > { %s1233_s16 = scalar_lea.hbm %s1609_s17, 128  ;;  %p1239_p7 = scmp.lt.u32.totalorder %s1609_s17, %s1884_s0 }
  0x42   : > { %p1234_p13 = scmp.ne.s32.totalorder %s1609_s17, %s1233_s16  ;;  %p1240_p9 = scmp.lt.u32.totalorder %s1238_s22, %s1233_s16 }
  0x43   : > { %p1242_p1 = scmp.lt.u32.totalorder %s1233_s16, %s1609_s17 }
  0x44   : > { %p1236_p3 = pnand %p1235_p0, %p1234_p13  ;;  %p1241_p2 = por %p1240_p9, %p1239_p7 }
  0x46   : > { %p1237_p5 = pneg %p1236_p3  ;;  %p1243_p4 = por %p1242_p1, %p1241_p2 }
  0x48   : > { %p1244_p6 = pnand %p1243_p4, %p1237_p5 }
  0x4a   : > { %1247 = shalt.err (!%p1244_p6)
}
  0x4b   : > { %s1248_s21 = scalar_lea.vmem %s1615_s14, 128  ;;  %s1458_s11 = smov [#allocation2]  }
  0x4c   : > { %p1249_p8 = scmp.ne.s32.totalorder %s1615_s14, %s1248_s21  ;;  %s1253_s29 = sshll.u32 %s1458_s11, 4  ;;  %s1254_s29 = int_to_ptr.vmem [resolvable:$false] %s1253_s29 }
  0x4d   : > { %s1255_s18 = scalar_lea.vmem %s1254_s29, 256  ;;  %p1256_p3 = scmp.lt.s32.totalorder %s1615_s14, %s1254_s29 }
  0x4e   : > { %p1251_p10 = pnand %p1249_p8, %p1235_p0  ;;  %p1257_p7 = scmp.lt.s32.totalorder %s1255_s18, %s1248_s21 }
  0x50   : > { %p1252_p13 = pneg %p1251_p10  ;;  %p1258_p9 = por %p1257_p7, %p1256_p3 }
  0x52   : > { %p1259_p2 = pnand %p1258_p9, %p1252_p13 }
  0x54   : > { %1262 = shalt.err (!%p1259_p2)
}
  0x55   : > { %1146 = dma.hbm_to_vmem [thread:$0]  (!%p1611_p11), %s1609_s17, 128, %s1615_s14, %s264_s10  }
  0x56   : > { %p1886_p5 = scmp.ne.s32.totalorder %s1879_s9, 0 }
  0x57   : > { %s1645_s16 = sand.u32 (!%p1886_p5), 1, %s1445_s25   ;;  %p1887_p0 = scmp.ne.s32.totalorder (!%p1886_p5), %s1877_s30, 0 }
  0x58   : > { %283 = sbr.rel (%p1886_p5) target bundleno = 460 (0x1cc), region = 32  ;;  %s1648_s22 = sshll.u32 (!%p1886_p5), %s1645_s16, 3 }
  0x59   : > { %s286_s23 = scalar_lea.sflag (!%p1886_p5), [#allocation3], %s1645_s16  ;;  %s289_s12 = scalar_lea.vmem (!%p1886_p5), [#allocation2], %s1648_s22 }
  0x5f   : > { %1420 = dma.done.wait (%p1887_p0), %s286_s23, 128  }
  0x60   : > { %1422 = vsyncadd (%p1887_p0), %s286_s23, 4294967168  ;;  %p1888_p11 = scmp.eq.s32.totalorder %s1528_s28, 0 }
  0x62   : > { %1424 = dma.done.wait (%p1888_p11), [#allocation6], 10240   ;;  %p1889_p1 = pmov %p1888_p11 }
  0x63   : > { %v1459_v0 = vmov 0.0   ;;  %v346_v1 = vld [vmem:[#allocation5 + $0x8] sm:$0xff]  ;;  %v351_v2 = vld [vmem:[#allocation5 + $0x30] sm:$0xff]  ;;  %v345_v3 = vld [vmem:[#allocation5] sm:$0xff]  ;;  %vm1461_vm0 = vmmov 0   ;;  %s1678_s14 = sshll.u32 %s1528_s28, 7 }
  0x64   : > { %1426 = vsyncadd (%p1889_p1), [#allocation6], 4294957056  ;;  %516 = vmatprep.mubr.f32.mxu0 %v1459_v0  ;;  %587 = vmatprep.mubr.f32.mxu1 %v1459_v0  ;;  %v1035_v4 = vpack.c.bf16 %v351_v2, %v346_v1  ;;  %v350_v5 = vld [vmem:[#allocation5 + $0x28] sm:$0xff]  ;;  %v356_v6 = vld [vmem:[#allocation5 + $0x58] sm:$0xff]  ;;  %s315_s15 = scalar_lea.vmem [#allocation7], %s1648_s22  ;;  %s322_s21 = scalar_lea.vmem [#allocation8], %s1648_s22 }
  0x65   : > { %v361_v7 = vld [vmem:[#allocation5 + $0x80] sm:$0xff]  ;;  %v1037_v8 = vpack.c.bf16 %v350_v5, %v345_v3  ;;  %v355_v10 = vld [vmem:[#allocation5 + $0x50] sm:$0xff]  ;;  %v360_v11 = vld [vmem:[#allocation5 + $0x78] sm:$0xff]  ;;  %s703_s10 = sshll.u32 %s315_s15, 4  ;;  %s716_s11 = sshll.u32 %s322_s21, 4  ;;  %s1688_s10 = int_to_ptr.vmem [resolvable:$true] %s703_s10  ;;  %s1696_s11 = int_to_ptr.vmem [resolvable:$true] %s716_s11 }
  0x66   : > { %v1039_v9 = vpack.c.bf16 %v361_v7, %v356_v6  ;;  %v366_v12 = vld [vmem:[#allocation5 + $0xa8] sm:$0xff]  ;;  %1036 = vmatprep.subr.bf16.mxu0 %v1035_v4  ;;  %v371_v13 = vld [vmem:[#allocation5 + $0xd0] sm:$0xff]  ;;  %v1041_v14 = vpack.c.bf16 %v360_v11, %v355_v10  ;;  %v365_v16 = vld [vmem:[#allocation5 + $0xa0] sm:$0xff]  ;;  %s1686_s23 = scalar_lea.hbm %s1866_s3, %s1678_s14  ;;  %s1694_s9 = scalar_lea.hbm %s1867_s4, %s1678_s14 }
  0x67   : > { %1038 = vmatpush1.bf16.msra.mxu0 %v1037_v8  ;;  %v1043_v15 = vpack.c.bf16 %v371_v13, %v366_v12  ;;  %v370_v17 = vld [vmem:[#allocation5 + $0xc8] sm:$0xff]  ;;  %v376_v18 = vld [vmem:[#allocation5 + $0xf8] sm:$0xff]  ;;  %v381_v19 = vld [vmem:[#allocation5 + $0x120] sm:$0xff]  ;;  %s670_s29 = scalar_lea.sflag [#allocation4], %s1645_s16  ;;  %s1263_s18 = scalar_lea.vmem %s1688_s10, 128 }
  0x68   : > { %1040 = vmatprep.subr.bf16.mxu0 %v1039_v9  ;;  %v1045_v20 = vpack.c.bf16 %v370_v17, %v365_v16  ;;  %v1047_v21 = vpack.c.bf16 %v381_v19, %v376_v18  ;;  %v375_v22 = vld [vmem:[#allocation5 + $0xf0] sm:$0xff]  ;;  %v380_v23 = vld [vmem:[#allocation5 + $0x118] sm:$0xff]  ;;  %v386_v24 = vld [vmem:[#allocation5 + $0x148] sm:$0xff]  ;;  %p1264_p4 = scmp.ne.s32.totalorder %s1688_s10, %s1263_s18  ;;  %s1462_s17 = smov [#allocation7]  }
  0x69   : > { %v391_v25 = vld [vmem:[#allocation5 + $0x170] sm:$0xff]  ;;  %v348_v26 = vld [vmem:[#allocation5 + $0x18] sm:$0xff]  ;;  %v385_v27 = vld [vmem:[#allocation5 + $0x140] sm:$0xff]  ;;  %v1049_v31 = vpack.c.bf16 %v380_v23, %v375_v22  ;;  %s1267_s0 = sshll.u32 %s1462_s17, 4  ;;  %s1268_s0 = int_to_ptr.vmem [resolvable:$false] %s1267_s0 }
  0x6a   : > { %v353_v28 = vld [vmem:[#allocation5 + $0x40] sm:$0xff]  ;;  %v347_v29 = vld [vmem:[#allocation5 + $0x10] sm:$0xff]  ;;  %v352_v30 = vld [vmem:[#allocation5 + $0x38] sm:$0xff]  ;;  %v1051_v37 = vpack.c.bf16 %v391_v25, %v386_v24  ;;  %p1265_p6 = pnand %p1264_p4, %p1600_p12  ;;  %s1269_s1 = scalar_lea.vmem %s1268_s0, 256 }
  0x6b   : > { %1042 = vmatpush1.bf16.msra.mxu0 %v1041_v14  ;;  %v390_v32 = vld [vmem:[#allocation5 + $0x168] sm:$0xff]  ;;  %v1067_v33 = vpack.c.bf16 %v353_v28, %v348_v26  ;;  %v1069_v34 = vpack.c.bf16 %v352_v30, %v347_v29  ;;  %v363_v36 = vld [vmem:[#allocation5 + $0x90] sm:$0xff]  ;;  %v396_v38 = vld [vmem:[#allocation5 + $0x198] sm:$0xff]  ;;  %p1270_p10 = scmp.lt.s32.totalorder %s1688_s10, %s1268_s0  ;;  %p1271_p13 = scmp.lt.s32.totalorder %s1269_s1, %s1263_s18 }
  0x6c   : > { %1044 = vmatprep.subr.bf16.mxu0 %v1043_v15  ;;  %v358_v35 = vld [vmem:[#allocation5 + $0x68] sm:$0xff]  ;;  %v401_v39 = vld [vmem:[#allocation5 + $0x1c0] sm:$0xff]  ;;  %v368_v43 = vld [vmem:[#allocation5 + $0xb8] sm:$0xff]  ;;  %v1053_v46 = vpack.c.bf16 %v390_v32, %v385_v27  ;;  %v1460_v32 = vmov 0.0|0.0   ;;  %p1266_p8 = pneg %p1265_p6 }
  0x6d   : > { %v1071_v40 = vpack.c.bf16 %v363_v36, %v358_v35  ;;  %v357_v41 = vld [vmem:[#allocation5 + $0x60] sm:$0xff]  ;;  %1068 = vmatprep.subr.bf16.mxu1 %v1067_v33  ;;  %v362_v42 = vld [vmem:[#allocation5 + $0x88] sm:$0xff]  ;;  %v395_v47 = vld [vmem:[#allocation5 + $0x190] sm:$0xff]  ;;  %v1055_v51 = vpack.c.bf16 %v401_v39, %v396_v38  ;;  %p1272_p3 = por %p1271_p13, %p1270_p10 }
  0x6e   : > { %v373_v44 = vld [vmem:[#allocation5 + $0xe0] sm:$0xff]  ;;  %1070 = vmatpush1.bf16.msra.mxu1 %v1069_v34  ;;  %v1073_v45 = vpack.c.bf16 %v362_v42, %v357_v41  ;;  %v367_v49 = vld [vmem:[#allocation5 + $0xb0] sm:$0xff]  ;;  %v372_v50 = vld [vmem:[#allocation5 + $0xd8] sm:$0xff] }
  0x6f   : > { %1046 = vmatpush1.bf16.msra.mxu0 %v1045_v20  ;;  %1072 = vmatprep.subr.bf16.mxu1 %v1071_v40  ;;  %v1075_v48 = vpack.c.bf16 %v373_v44, %v368_v43  ;;  %v400_v52 = vld [vmem:[#allocation5 + $0x1b8] sm:$0xff]  ;;  %v378_v53 = vld [vmem:[#allocation5 + $0x108] sm:$0xff]  ;;  %v383_v54 = vld [vmem:[#allocation5 + $0x130] sm:$0xff]  ;;  %v1077_v57 = vpack.c.bf16 %v372_v50, %v367_v49  ;;  %p1273_p7 = pnand %p1272_p3, %p1266_p8 }
  0x70   : > { %1048 = vmatprep.subr.bf16.mxu0 %v1047_v21  ;;  %v406_v55 = vld [vmem:[#allocation5 + $0x1e8] sm:$0xff]  ;;  %v411_v56 = vld [vmem:[#allocation5 + $0x210] sm:$0xff]  ;;  %v1057_v58 = vpack.c.bf16 %v400_v52, %v395_v47  ;;  %v405_v59 = vld [vmem:[#allocation5 + $0x1e0] sm:$0xff]  ;;  %v1079_v60 = vpack.c.bf16 %v383_v54, %v378_v53 }
  0x71   : > { %v377_v61 = vld [vmem:[#allocation5 + $0x100] sm:$0xff]  ;;  %v382_v62 = vld [vmem:[#allocation5 + $0x128] sm:$0xff]  ;;  %v1059_v63 = vpack.c.bf16 %v411_v56, %v406_v55  ;;  %v388_v2 = vld [vmem:[#allocation5 + $0x158] sm:$0xff] }
  0x72   : > { %1074 = vmatpush1.bf16.msra.mxu1 %v1073_v45  ;;  %v410_v1 = vld [vmem:[#allocation5 + $0x208] sm:$0xff]  ;;  %v393_v3 = vld [vmem:[#allocation5 + $0x180] sm:$0xff]  ;;  %v416_v4 = vld [vmem:[#allocation5 + $0x238] sm:$0xff]  ;;  %v1081_v6 = vpack.c.bf16 %v382_v62, %v377_v61 }
  0x73   : > { %1050 = vmatpush1.bf16.msra.mxu0 %v1049_v31  ;;  %1076 = vmatprep.subr.bf16.mxu1 %v1075_v48  ;;  %v421_v5 = vld [vmem:[#allocation5 + $0x260] sm:$0xff]  ;;  %v1061_v7 = vpack.c.bf16 %v410_v1, %v405_v59  ;;  %v415_v8 = vld [vmem:[#allocation5 + $0x230] sm:$0xff]  ;;  %v1083_v9 = vpack.c.bf16 %v393_v3, %v388_v2  ;;  %v392_v11 = vld [vmem:[#allocation5 + $0x178] sm:$0xff]  ;;  %v427_v59 = vlaneseq }
  0x74   : > { %1052 = vmatprep.subr.bf16.mxu0 %v1051_v37  ;;  %v387_v10 = vld [vmem:[#allocation5 + $0x150] sm:$0xff]  ;;  %v1063_v12 = vpack.c.bf16 %v421_v5, %v416_v4  ;;  %v420_v13 = vld [vmem:[#allocation5 + $0x258] sm:$0xff]  ;;  %v398_v14 = vld [vmem:[#allocation5 + $0x1a8] sm:$0xff] }
  0x75   : > { %v403_v15 = vld [vmem:[#allocation5 + $0x1d0] sm:$0xff]  ;;  %v1085_v16 = vpack.c.bf16 %v392_v11, %v387_v10  ;;  %v1065_v17 = vpack.c.bf16 %v420_v13, %v415_v8  ;;  %v349_v18 = vld [vmem:[#allocation5 + $0x20] sm:$0xff]  ;;  %v402_v21 = vld [vmem:[#allocation5 + $0x1c8] sm:$0xff] }
  0x76   : > { %1078 = vmatpush1.bf16.msra.mxu1 %v1077_v57  ;;  %v1087_v19 = vpack.c.bf16 %v403_v15, %v398_v14  ;;  %v397_v20 = vld [vmem:[#allocation5 + $0x1a0] sm:$0xff]  ;;  %v354_v22 = vld [vmem:[#allocation5 + $0x48] sm:$0xff]  ;;  %v408_v23 = vld [vmem:[#allocation5 + $0x1f8] sm:$0xff] }
  0x77   : > { %1054 = vmatpush1.bf16.msra.mxu0 %v1053_v46  ;;  %1080 = vmatprep.subr.bf16.mxu1 %v1079_v60  ;;  %v413_v24 = vld [vmem:[#allocation5 + $0x220] sm:$0xff]  ;;  %v344_v25 = vld [vmem:[%s289_s12] sm:$0xff]  ;;  %v1089_v26 = vpack.c.bf16 %v402_v21, %v397_v20  ;;  %v1100_v27 = vpack.c.bf16 %v354_v22, %v349_v18  ;;  %v418_v34 = vld [vmem:[#allocation5 + $0x248] sm:$0xff]  ;;  %v1665_v60 = vshrl.u32 %v427_v59, 7 }
  0x78   : > { %1056 = vmatprep.subr.bf16.mxu0 %v1055_v51  ;;  %v359_v28 = vld [vmem:[#allocation5 + $0x70] sm:$0xff]  ;;  %v1091_v29 = vpack.c.bf16 %v413_v24, %v408_v23  ;;  %v412_v31 = vld [vmem:[#allocation5 + $0x218] sm:$0xff]  ;;  %v417_v39 = vld [vmem:[#allocation5 + $0x240] sm:$0xff] }
  0x79   : > { %v407_v30 = vld [vmem:[#allocation5 + $0x1f0] sm:$0xff]  ;;  %v364_v33 = vld [vmem:[#allocation5 + $0x98] sm:$0xff]  ;;  %v422_v40 = vld [vmem:[#allocation5 + $0x268] sm:$0xff]  ;;  %v429_v61 = vsub.s32 0, %v1665_v60 }
  0x7a   : > { %1082 = vmatpush1.bf16.msra.mxu1 %v1081_v6  ;;  %v423_v35 = vld [vmem:[#allocation5 + $0x270] sm:$0xff]  ;;  %v1093_v36 = vpack.c.bf16 %v412_v31, %v407_v30  ;;  %v1103_v37 = vpack.c.bf16 %v364_v33, %v359_v28  ;;  %v369_v41 = vld [vmem:[#allocation5 + $0xc0] sm:$0xff]  ;;  %v374_v42 = vld [vmem:[#allocation5 + $0xe8] sm:$0xff]  ;;  %v1097_v43 = vpack.c.bf16 %v422_v40, %v417_v39 }
  0x7b   : > { %1058 = vmatpush1.bf16.msra.mxu0 %v1057_v58  ;;  %1084 = vmatprep.subr.bf16.mxu1 %v1083_v9  ;;  %v1095_v38 = vpack.c.bf16 %v423_v35, %v418_v34  ;;  %v1106_v44 = vpack.c.bf16 %v374_v42, %v369_v41  ;;  %v379_v45 = vld [vmem:[#allocation5 + $0x110] sm:$0xff]  ;;  %v384_v46 = vld [vmem:[#allocation5 + $0x138] sm:$0xff]  ;;  %v389_v48 = vld [vmem:[#allocation5 + $0x160] sm:$0xff] }
  0x7c   : > { %1060 = vmatprep.subr.bf16.mxu0 %v1059_v63  ;;  %v1109_v47 = vpack.c.bf16 %v384_v46, %v379_v45  ;;  %v394_v49 = vld [vmem:[#allocation5 + $0x188] sm:$0xff]  ;;  %v399_v51 = vld [vmem:[#allocation5 + $0x1b0] sm:$0xff]  ;;  %v409_v53 = vld [vmem:[#allocation5 + $0x200] sm:$0xff]  ;;  %v433_v63 = vsub.s32 1, %v1665_v60 }
  0x7d   : > { %v1112_v50 = vpack.c.bf16 %v394_v49, %v389_v48  ;;  %v414_v54 = vld [vmem:[#allocation5 + $0x228] sm:$0xff]  ;;  %v419_v56 = vld [vmem:[#allocation5 + $0x250] sm:$0xff]  ;;  %v424_v57 = vld [vmem:[#allocation5 + $0x278] sm:$0xff] }
  0x7e   : > { %1086 = vmatpush1.bf16.msra.mxu1 %v1085_v16  ;;  %v1118_v55 = vpack.c.bf16 %v414_v54, %v409_v53  ;;  %v1121_v58 = vpack.c.bf16 %v424_v57, %v419_v56  ;;  %v1671_v62 = vld [vmem:[%s1865_s2] sm:$0x1f] }
  0x7f   : > { %1062 = vmatpush1.bf16.msra.mxu0 %v1061_v7  ;;  %1088 = vmatprep.subr.bf16.mxu1 %v1087_v19  ;;  %v430_v1 = vrot.slane %v1671_v62, %v429_v61  ;;  %v434_v2 = vrot.slane %v1671_v62, %v433_v63  ;;  %v437_v7 = vsub.s32 2, %v1665_v60 }
  0x80   : > { %1064 = vmatprep.subr.bf16.mxu0 %v1063_v12 }
  0x82   : > { %1090 = vmatpush1.bf16.msra.mxu1 %v1089_v26 }
  0x83   : > { %1066 = vmatpush1.bf16.msra.mxu0 %v1065_v17  ;;  %1092 = vmatprep.subr.bf16.mxu1 %v1091_v29 }
  0x84   : > { %1099 = vmatprep.subr.bf16.mxu0 %v1460_v32 }
  0x86   : > { %517 = vmatmul.mubr.f32.vlgmr.msra.gmra.mrb[0].mxu0 %v344_v25  ;;  %1094 = vmatpush1.bf16.msra.mxu1 %v1093_v36 }
  0x87   : > { %1101 = vmatpush3.bf16.msra.mxu0 %v1100_v27  ;;  %1032 = vmatprep.mubr.msk.f32.mxu0 %vm1461_vm0, %v1459_v0  ;;  %v404_v0 = vld [vmem:[#allocation5 + $0x1d8] sm:$0xff] }
  0x88   : > { %1102 = vmatprep.subr.bf16.mxu0 %v1460_v32  ;;  %1096 = vmatprep.subr.bf16.mxu1 %v1095_v38  ;;  %v1115_v52 = vpack.c.bf16 %v404_v0, %v399_v51 }
  0x8a   : > { %1098 = vmatpush1.bf16.msra.mxu1 %v1097_v43 }
  0x8b   : > { %1104 = vmatpush3.bf16.msra.mxu0 %v1103_v37 }
  0x8c   : > { %1105 = vmatprep.subr.bf16.mxu0 %v1460_v32 }
  0x8d   : > { %588 = vmatmul.mubr.f32.vlgmr.msra.gmra.mrb[0].mxu1 %v344_v25 }
  0x8f   : > { %1107 = vmatpush3.bf16.msra.mxu0 %v1106_v44 }
  0x90   : > { %1108 = vmatprep.subr.bf16.mxu0 %v1460_v32 }
  0x93   : > { %1110 = vmatpush3.bf16.msra.mxu0 %v1109_v47 }
  0x94   : > { %1111 = vmatprep.subr.bf16.mxu0 %v1460_v32 }
  0x97   : > { %1113 = vmatpush3.bf16.msra.mxu0 %v1112_v50 }
  0x98   : > { %1114 = vmatprep.subr.bf16.mxu0 %v1460_v32 }
  0x9b   : > { %1116 = vmatpush3.bf16.msra.mxu0 %v1115_v52 }
  0x9c   : > { %1117 = vmatprep.subr.bf16.mxu0 %v1460_v32 }
  0x9f   : > { %1119 = vmatpush3.bf16.msra.mxu0 %v1118_v55 }
  0xa0   : > { %1120 = vmatprep.subr.bf16.mxu0 %v1460_v32 }
  0xa3   : > { %1122 = vmatpush3.bf16.msra.mxu0 %v1121_v58 }
  0xa6   : > { %1033 = vmatmul.mubr.f32.vlgmr.msra.gmra.mrb[2].mxu0 %v344_v25 }
 0x159   : > { %v518_v3 = vpop.f32.mrb[0].mxu0 }
 0x15a   : > { %v519_v4 = vadd.f32 %v518_v3, %v430_v1  ;;  %v520_v5 = vpop.f32.mrb[1].mxu0 }
 0x15b   : > { %v521_v6 = vadd.f32 %v520_v5, %v434_v2 }
 0x15c   : > { %664 = vst [vmem:[%s315_s15] sm:$0xff] %v519_v4 }
 0x15d   : > { %665 = vst [vmem:[%s322_s21] sm:$0xff] %v521_v6 }
 0x15e   : > { %1276 = shalt.err (!%p1273_p7)
}
 0x15f   : > { %s1277_s16 = scalar_lea.hbm %s1686_s23, 128  ;;  %s1281_s17 = scalar_lea.hbm %s1866_s3, 256 }
 0x160   : > { %p1278_p9 = scmp.ne.s32.totalorder %s1686_s23, %s1277_s16  ;;  %p1282_p0 = scmp.lt.u32.totalorder %s1686_s23, %s1866_s3 }
 0x161   : > { %p1283_p11 = scmp.lt.u32.totalorder %s1281_s17, %s1277_s16  ;;  %p1285_p4 = scmp.lt.u32.totalorder %s1277_s16, %s1686_s23 }
 0x162   : > { %p1279_p2 = pnand %p1278_p9, %p1600_p12 }
 0x163   : > { %p1284_p1 = por %p1283_p11, %p1282_p0 }
 0x164   : > { %p1280_p5 = pneg %p1279_p2 }
 0x165   : > { %p1286_p6 = por %p1285_p4, %p1284_p1 }
 0x167   : > { %p1287_p8 = pnand %p1286_p6, %p1280_p5 }
 0x169   : > { %1290 = shalt.err (!%p1287_p8)
}
 0x16a   : > { %1129 = dma.vmem_to_hbm [thread:$0]  (%p1600_p12), %s1688_s10, 128, %s1686_s23, %s670_s29   ;;  %v441_v8 = vsub.s32 3, %v1665_v60 }
 0x16b   : > { %s1890_s1 = sand.u32 1, %s1528_s28   ;;  %s1291_s18 = scalar_lea.vmem %s1696_s11, 128 }
 0x16c   : > { %s1724_s30 = scalar_lea.sflag [#allocation9], %s1890_s1  ;;  %p1292_p10 = scmp.ne.s32.totalorder %s1696_s11, %s1291_s18 }
 0x16d   : > { %s1463_s16 = smov [#allocation8]  }
 0x16e   : > { %p1293_p13 = pnand %p1292_p10, %p1600_p12  ;;  %s1295_s15 = sshll.u32 %s1463_s16, 4  ;;  %s1296_s15 = int_to_ptr.vmem [resolvable:$false] %s1295_s15 }
 0x16f   : > { %s1297_s21 = scalar_lea.vmem %s1296_s15, 256  ;;  %p1298_p7 = scmp.lt.s32.totalorder %s1696_s11, %s1296_s15 }
 0x170   : > { %p1294_p3 = pneg %p1293_p13  ;;  %p1299_p9 = scmp.lt.s32.totalorder %s1297_s21, %s1291_s18 }
 0x172   : > { %p1300_p2 = por %p1299_p9, %p1298_p7 }
 0x174   : > { %p1301_p5 = pnand %p1300_p2, %p1294_p3 }
 0x176   : > { %1304 = shalt.err (!%p1301_p5)
}
 0x177   : > { %s1305_s10 = scalar_lea.hbm %s1694_s9, 128  ;;  %s1309_s17 = scalar_lea.hbm %s1867_s4, 256 }
 0x178   : > { %p1306_p0 = scmp.ne.s32.totalorder %s1694_s9, %s1305_s10  ;;  %p1310_p4 = scmp.lt.u32.totalorder %s1694_s9, %s1867_s4 }
 0x179   : > { %p1311_p6 = scmp.lt.u32.totalorder %s1309_s17, %s1305_s10  ;;  %p1313_p10 = scmp.lt.u32.totalorder %s1305_s10, %s1694_s9 }
 0x17a   : > { %p1307_p11 = pnand %p1306_p0, %p1600_p12 }
 0x17b   : > { %p1312_p8 = por %p1311_p6, %p1310_p4 }
 0x17c   : > { %p1308_p1 = pneg %p1307_p11 }
 0x17d   : > { %p1314_p13 = por %p1313_p10, %p1312_p8 }
 0x17f   : > { %p1315_p3 = pnand %p1314_p13, %p1308_p1 }
 0x181   : > { %1318 = shalt.err (!%p1315_p3)
}
 0x182   : > { %1130 = dma.vmem_to_hbm [thread:$0]  (%p1600_p12), %s1696_s11, 128, %s1694_s9, %s1724_s30   ;;  %v438_v9 = vrot.slane %v1671_v62, %v437_v7  ;;  %v442_v10 = vrot.slane %v1671_v62, %v441_v8  ;;  %v589_v11 = vpop.f32.mrb[0].mxu1 }
 0x183   : > { %s329_s1 = scalar_lea.vmem [#allocation10], %s1648_s22  ;;  %s336_s16 = scalar_lea.vmem [#allocation11], %s1648_s22  ;;  %v591_v13 = vpop.f32.mrb[1].mxu1 }
 0x184   : > { %s729_s18 = sshll.u32 %s329_s1, 4  ;;  %s742_s15 = sshll.u32 %s336_s16, 4  ;;  %v590_v12 = vadd.f32 %v589_v11, %v438_v9  ;;  %v592_v14 = vadd.f32 %v591_v13, %v442_v10  ;;  %s1758_s18 = int_to_ptr.vmem [resolvable:$true] %s729_s18  ;;  %s1766_s15 = int_to_ptr.vmem [resolvable:$true] %s742_s15 }
 0x185   : > { %s1756_s23 = scalar_lea.hbm %s1868_s5, %s1678_s14  ;;  %s1764_s29 = scalar_lea.hbm %s1869_s6, %s1678_s14 }
 0x186   : > { %666 = vst [vmem:[%s329_s1] sm:$0xff] %v590_v12  ;;  %667 = vst [vmem:[%s336_s16] sm:$0xff] %v592_v14  ;;  %s1319_s17 = scalar_lea.vmem %s1758_s18, 128  ;;  %s1464_s12 = smov [#allocation10]  }
 0x187   : > { %p1320_p7 = scmp.ne.s32.totalorder %s1758_s18, %s1319_s17  ;;  %s1323_s0 = sshll.u32 %s1464_s12, 4  ;;  %s1324_s0 = int_to_ptr.vmem [resolvable:$false] %s1323_s0 }
 0x188   : > { %s1325_s21 = scalar_lea.vmem %s1324_s0, 256  ;;  %p1326_p5 = scmp.lt.s32.totalorder %s1758_s18, %s1324_s0 }
 0x189   : > { %p1321_p9 = pnand %p1320_p7, %p1600_p12  ;;  %p1327_p0 = scmp.lt.s32.totalorder %s1325_s21, %s1319_s17 }
 0x18b   : > { %p1322_p2 = pneg %p1321_p9  ;;  %p1328_p11 = por %p1327_p0, %p1326_p5 }
 0x18d   : > { %p1329_p1 = pnand %p1328_p11, %p1322_p2 }
 0x18f   : > { %1332 = shalt.err (!%p1329_p1)
}
 0x190   : > { %s1333_s1 = scalar_lea.hbm %s1756_s23, 128  ;;  %s1337_s11 = scalar_lea.hbm %s1868_s5, 256 }
 0x191   : > { %p1334_p4 = scmp.ne.s32.totalorder %s1756_s23, %s1333_s1  ;;  %p1338_p10 = scmp.lt.u32.totalorder %s1756_s23, %s1868_s5 }
 0x192   : > { %p1339_p13 = scmp.lt.u32.totalorder %s1337_s11, %s1333_s1  ;;  %p1341_p7 = scmp.lt.u32.totalorder %s1333_s1, %s1756_s23 }
 0x193   : > { %p1335_p6 = pnand %p1334_p4, %p1600_p12 }
 0x194   : > { %p1340_p3 = por %p1339_p13, %p1338_p10 }
 0x195   : > { %p1336_p8 = pneg %p1335_p6 }
 0x196   : > { %p1342_p9 = por %p1341_p7, %p1340_p3 }
 0x198   : > { %p1343_p2 = pnand %p1342_p9, %p1336_p8 }
 0x19a   : > { %1346 = shalt.err (!%p1343_p2)
}
 0x19b   : > { %1131 = dma.vmem_to_hbm [thread:$0]  (%p1600_p12), %s1758_s18, 128, %s1756_s23, %s1724_s30  }
 0x19c   : > { %s1891_s17 = sand.u32 1, %s1528_s28   ;;  %s1347_s21 = scalar_lea.vmem %s1766_s15, 128 }
 0x19d   : > { %s1792_s0 = scalar_lea.sflag [#allocation12], %s1891_s17  ;;  %p1348_p5 = scmp.ne.s32.totalorder %s1766_s15, %s1347_s21 }
 0x19e   : > { %s1465_s1 = smov [#allocation11]  }
 0x19f   : > { %p1349_p0 = pnand %p1348_p5, %p1600_p12  ;;  %s1351_s16 = sshll.u32 %s1465_s1, 4  ;;  %s1352_s16 = int_to_ptr.vmem [resolvable:$false] %s1351_s16 }
 0x1a0   : > { %s1353_s10 = scalar_lea.vmem %s1352_s16, 256  ;;  %p1354_p1 = scmp.lt.s32.totalorder %s1766_s15, %s1352_s16 }
 0x1a1   : > { %p1350_p11 = pneg %p1349_p0  ;;  %p1355_p4 = scmp.lt.s32.totalorder %s1353_s10, %s1347_s21 }
 0x1a3   : > { %p1356_p6 = por %p1355_p4, %p1354_p1 }
 0x1a5   : > { %p1357_p8 = pnand %p1356_p6, %p1350_p11 }
 0x1a7   : > { %1360 = shalt.err (!%p1357_p8)
}
 0x1a8   : > { %s1361_s28 = scalar_lea.hbm %s1764_s29, 128  ;;  %s1365_s23 = scalar_lea.hbm %s1869_s6, 256 }
 0x1a9   : > { %p1362_p10 = scmp.ne.s32.totalorder %s1764_s29, %s1361_s28  ;;  %p1366_p7 = scmp.lt.u32.totalorder %s1764_s29, %s1869_s6 }
 0x1aa   : > { %p1367_p9 = scmp.lt.u32.totalorder %s1365_s23, %s1361_s28  ;;  %p1369_p5 = scmp.lt.u32.totalorder %s1361_s28, %s1764_s29 }
 0x1ab   : > { %p1363_p13 = pnand %p1362_p10, %p1600_p12 }
 0x1ac   : > { %p1368_p2 = por %p1367_p9, %p1366_p7 }
 0x1ad   : > { %p1364_p3 = pneg %p1363_p13 }
 0x1ae   : > { %p1370_p0 = por %p1369_p5, %p1368_p2 }
 0x1b0   : > { %p1371_p11 = pnand %p1370_p0, %p1364_p3 }
 0x1b2   : > { %1374 = shalt.err (!%p1371_p11)
}
 0x1b3   : > { %1132 = dma.vmem_to_hbm [thread:$0]  (%p1600_p12), %s1766_s15, 128, %s1764_s29, %s1792_s0   ;;  %v445_v15 = vsub.s32 4, %v1665_v60  ;;  %v660_v17 = vpop.f32.mrb[2].mxu0 }
 0x1b4   : > { %s343_s12 = scalar_lea.vmem [#allocation13], %s1648_s22  ;;  %v1034_v19 = vpop.f32.mrb[3].mxu0  ;;  %s1823_s16 = scalar_lea.hbm %s1870_s7, %s1678_s14 }
 0x1b5   : > { %v446_v16 = vrot.slane %v1671_v62, %v445_v15  ;;  %s755_s17 = sshll.u32 %s343_s12, 4  ;;  %s1466_s15 = smov [#allocation13]   ;;  %s756_s17 = int_to_ptr.vmem [resolvable:$true] %s755_s17 }
 0x1b6   : > { %s1375_s10 = scalar_lea.vmem %s756_s17, 128  ;;  %s1379_s29 = sshll.u32 %s1466_s15, 4  ;;  %s1380_s29 = int_to_ptr.vmem [resolvable:$false] %s1379_s29 }
 0x1b7   : > { %v661_v18 = vadd.f32 %v660_v17, %v446_v16  ;;  %p1376_p1 = scmp.ne.s32.totalorder %s756_s17, %s1375_s10  ;;  %s1381_s22 = scalar_lea.vmem %s1380_s29, 256 }
 0x1b8   : > { %p1382_p8 = scmp.lt.s32.totalorder %s756_s17, %s1380_s29  ;;  %p1383_p10 = scmp.lt.s32.totalorder %s1381_s22, %s1375_s10 }
 0x1b9   : > { %668 = vst [vmem:[%s343_s12] sm:$0xff] %v661_v18  ;;  %p1377_p4 = pnand %p1376_p1, %p1600_p12 }
 0x1ba   : > { %p1384_p13 = por %p1383_p10, %p1382_p8 }
 0x1bb   : > { %p1378_p6 = pneg %p1377_p4 }
 0x1bd   : > { %p1385_p3 = pnand %p1384_p13, %p1378_p6 }
 0x1bf   : > { %1388 = shalt.err (!%p1385_p3)
}
 0x1c0   : > { %s1389_s14 = scalar_lea.hbm %s1823_s16, 128  ;;  %s1393_s18 = scalar_lea.hbm %s1870_s7, 256 }
 0x1c1   : > { %p1390_p7 = scmp.ne.s32.totalorder %s1823_s16, %s1389_s14  ;;  %p1394_p5 = scmp.lt.u32.totalorder %s1823_s16, %s1870_s7 }
 0x1c2   : > { %p1395_p0 = scmp.lt.u32.totalorder %s1393_s18, %s1389_s14  ;;  %p1397_p1 = scmp.lt.u32.totalorder %s1389_s14, %s1823_s16 }
 0x1c3   : > { %p1391_p9 = pnand %p1390_p7, %p1600_p12 }
 0x1c4   : > { %p1396_p11 = por %p1395_p0, %p1394_p5 }
 0x1c5   : > { %p1392_p2 = pneg %p1391_p9 }
 0x1c6   : > { %p1398_p4 = por %p1397_p1, %p1396_p11 }
 0x1c8   : > { %p1399_p6 = pnand %p1398_p4, %p1392_p2 }
 0x1ca   : > { %1402 = shalt.err (!%p1399_p6)
}
 0x1cb   : > { %1133 = dma.vmem_to_hbm [thread:$0]  (%p1600_p12), %s756_s17, 128, %s1823_s16, %s1792_s0  }
 0x1cc PF: > { %s767_s9 = sand.u32 1, %s1441_s24   ;;  %p1892_p8 = scmp.ne.s32.totalorder %s1878_s8, 0 }
 0x1cd   : > { %p1893_p10 = scmp.ge.s32.totalorder %s1453_s27, 2  ;;  %s768_s12 = scalar_lea.sflag [#allocation4], %s767_s9 }
 0x1cf   : > { %p1148_p13 = pnand %p1893_p10, %p1892_p8 }
 0x1d1   : > { %1428 = dma.done.wait (!%p1148_p13), %s768_s12, 128  }
 0x1d2   : > { %1430 = vsyncadd (!%p1148_p13), %s768_s12, 4294967168  ;;  %s1894_s21 = sadd.s32 4294967294, %s1453_s27  }
 0x1d3   : > { %s776_s1 = sand.u32 1, %s1894_s21  }
 0x1d4   : > { %s777_s10 = scalar_lea.sflag [#allocation9], %s776_s1 }
 0x1d5   : > { %1432 = dma.done.wait (!%p1148_p13), %s777_s10, 256  }
 0x1d6   : > { %1434 = vsyncadd (!%p1148_p13), %s777_s10, 4294967040  ;;  %s795_s20 = scalar_lea.sflag [#allocation12], %s776_s1 }
 0x1d7   : > { %1436 = dma.done.wait (!%p1148_p13), %s795_s20, 256  }
 0x1d8   : > { %1438 = vsyncadd (!%p1148_p13), %s795_s20, 4294967040  ;;  %p28_p12 = scmp.ge.s32.totalorder %s1565_s13, 4   ;;  %s1895_s24 = smov %s1445_s25 }
 0x1d9   : > { %s1896_s25 = smov %s1449_s26  ;;  %s1897_s26 = smov %s1596_s19 }
 0x1da   : > { %s1898_s27 = smov %s1565_s13  ;;  %30 = sbr.rel (!%p28_p12) target bundleno = 13 (0xd), region = 145 }
 0x1e1   :  { %809 = vsyncpa [#allocation3], 1 }
 0x1e2   :  { %811 = vsyncpa [#allocation3 + $0x1], 1 }
 0x1e3   :  { %812 = vsyncpa [#allocation6], 1 }
 0x1e4   :  { %813 = vsyncpa [#allocation4], 1 }
 0x1e5   :  { %815 = vsyncpa [#allocation4 + $0x1], 1 }
 0x1e6   :  { %816 = vsyncpa [#allocation9], 1 }
 0x1e7   :  { %818 = vsyncpa [#allocation9 + $0x1], 1 }
 0x1e8   :  { %819 = vsyncpa [#allocation12], 1 }
 0x1e9   :  { %821 = vsyncpa [#allocation12 + $0x1], 1 }

</bundles_post_ra>
